<compile_context>
chip_gen: v7x
topology: tpu7x:2x2x1
jax: 0.10.0
libtpu: 0.0.40
codegen_flags: <defaults>
</compile_context>

<pallas_src>
import functools

import jax
import jax.numpy as jnp
from jax.experimental import pallas as pl
from jax.experimental.pallas import tpu as pltpu


def _channel_attention_kernel(x_ref, w1t_ref, w2t_ref, o_ref,
                              sum_acc, max_acc,
                              *, hw_total, tile_hw, needs_mask):
    # x_ref: (TB, C, T)   w1t_ref: (C, Cr)   w2t_ref: (Cr, C)   o_ref: (TB, C)
    # sum_acc / max_acc: (TB, C) f32 accumulators resident across the k axis.
    k = pl.program_id(1)
    n_k = pl.num_programs(1)

    @pl.when(k == 0)
    def _init():
        sum_acc[...] = jnp.zeros_like(sum_acc)
        max_acc[...] = jnp.full_like(max_acc, -jnp.inf)

    # Per-tile cast only (no whole-array f32 copy); accumulate in f32.
    x = x_ref[...].astype(jnp.float32)          # (TB, C, T)

    if needs_mask:
        lane = jax.lax.broadcasted_iota(jnp.int32, x.shape, dimension=2)
        valid = (k * tile_hw + lane) < hw_total
        x_sum = jnp.where(valid, x, 0.0)
        x_max = jnp.where(valid, x, -jnp.inf)
    else:
        x_sum = x
        x_max = x

    # Per-tile lane reduce (XLU slot; hidden behind DMA for a mem-bound kernel)
    # into tiny (TB, C) accumulators.
    sum_acc[...] = sum_acc[...] + jnp.sum(x_sum, axis=-1)
    max_acc[...] = jnp.maximum(max_acc[...], jnp.max(x_max, axis=-1))

    @pl.when(k == n_k - 1)
    def _finalize():
        avg = sum_acc[...] * (1.0 / float(hw_total))                     # (TB, C)
        mx = max_acc[...]                                                # (TB, C)

        # Shared MLP run once on the stacked (avg; max) rows -> 2 matmuls.
        pooled = jnp.concatenate([avg, mx], axis=0)                      # (2*TB, C)
        w1t = w1t_ref[...].astype(jnp.float32)                           # (C, Cr)
        w2t = w2t_ref[...].astype(jnp.float32)                           # (Cr, C)
        h = jnp.maximum(
            jnp.dot(pooled, w1t, preferred_element_type=jnp.float32), 0.0)
        # TODO(synk): Dropout2d is identity in eval/inference mode; not applied.
        y = jnp.dot(h, w2t, preferred_element_type=jnp.float32)          # (2*TB, C)

        tb = avg.shape[0]
        out = jax.nn.sigmoid(y[:tb] + y[tb:])
        o_ref[...] = out.astype(o_ref.dtype)


def channel_attention(x, w1, w2, *, tile_hw=None, vmem_limit_bytes=None):
    """x: (B, C, H, W) NCHW.  w1: (Cr, C, 1, 1).  w2: (C, Cr, 1, 1)."""
    B, C, H, W = x.shape
    Cr = w1.shape[0]
    HW = H * W

    x_flat = x.reshape(B, C, HW)
    w1t = w1.reshape(Cr, C).T   # (C, Cr)
    w2t = w2.reshape(C, Cr).T   # (Cr, C)

    # Batch block: multiple of 8 (sublane) when possible, else the full batch.
    if B >= 16 and B % 8 == 0:
        tb = 8
    else:
        tb = B
    n_b = B // tb

    # Spatial tile: multiple of 128 lanes (or full extent).  Because the
    # persistent accumulators are only (TB, C), the only big VMEM consumer is
    # the double-buffered input block; auto-pick the largest tile that keeps
    # one block under ~4 MiB (safe under the default scoped-VMEM limit on all
    # TPU generations).
    itemsize = jnp.dtype(x.dtype).itemsize
    if tile_hw is None:
        budget_bytes = 4 * 1024 * 1024
        tile_hw = max(128, budget_bytes // max(1, tb * C * itemsize))
    if HW <= tile_hw:
        t = HW
    else:
        t = max((tile_hw // 128) * 128, 128)
    n_k = pl.cdiv(HW, t)
    needs_mask = (HW % t) != 0

    kernel = functools.partial(
        _channel_attention_kernel,
        hw_total=HW, tile_hw=t, needs_mask=needs_mask)

    out = pl.pallas_call(
        kernel,
        out_shape=jax.ShapeDtypeStruct((B, C), x.dtype),
        grid_spec=pltpu.PrefetchScalarGridSpec(
            num_scalar_prefetch=0,
            grid=(n_b, n_k),
            in_specs=[
                pl.BlockSpec((tb, C, t), lambda b, k: (b, 0, k)),
                pl.BlockSpec((C, Cr), lambda b, k: (0, 0)),
                pl.BlockSpec((Cr, C), lambda b, k: (0, 0)),
            ],
            out_specs=pl.BlockSpec((tb, C), lambda b, k: (b, 0)),
            scratch_shapes=[
                pltpu.VMEM((tb, C), jnp.float32),   # running sum
                pltpu.VMEM((tb, C), jnp.float32),   # running max
            ],
        ),
        compiler_params=pltpu.CompilerParams(
            dimension_semantics=("parallel", "arbitrary"),
            vmem_limit_bytes=vmem_limit_bytes),
    )(x_flat, w1t, w2t)

    return out.reshape(B, C, 1, 1)


def channel_attention_ref(x, w1, w2):
    """Pure-JAX reference mirroring the PyTorch forward (eval mode)."""
    B, C, H, W = x.shape
    Cr = w1.shape[0]
    avg = jnp.mean(x, axis=(2, 3))          # (B, C)
    mx = jnp.max(x, axis=(2, 3))            # (B, C)
    w1m = w1.reshape(Cr, C)
    w2m = w2.reshape(C, Cr)

    def mlp(v):
        h = jnp.maximum(v @ w1m.T, 0.0)
        return h @ w2m.T

    return jax.nn.sigmoid(mlp(avg) + mlp(mx)).reshape(B, C, 1, 1)


if __name__ == "__main__":
    # Small shapes consistent with the module: batch=2, channels=4, spatial=16.
    B, C, H, W = 2, 4, 16, 16
    reduction = 2
    Cr = C // reduction

    key = jax.random.PRNGKey(0)
    kx, k1, k2 = jax.random.split(key, 3)

    x = jax.random.normal(kx, (B, C, H, W), dtype=jnp.float32)
    # Deterministic synthetic weights, shapes from nn.Conv2d(..., 1, bias=False).
    w1 = jax.random.normal(k1, (Cr, C, 1, 1), dtype=jnp.float32) * 0.5
    w2 = jax.random.normal(k2, (C, Cr, 1, 1), dtype=jnp.float32) * 0.5

    out = channel_attention(x, w1, w2)
    out = jax.block_until_ready(out)

    ref = channel_attention_ref(x, w1, w2)
    assert out.shape == (B, C, 1, 1)
    assert jnp.allclose(out, ref, atol=1e-5, rtol=1e-5), "mismatch vs reference"

    # Also exercise a multi-tile spatial grid (padded last tile) for coverage.
    H2, W2 = 24, 24                                   # HW=576 -> tiles of 128 + mask
    x2 = jax.random.normal(kx, (B, C, H2, W2), dtype=jnp.float32)
    out2 = jax.block_until_ready(channel_attention(x2, w1, w2, tile_hw=128))
    ref2 = channel_attention_ref(x2, w1, w2)
    assert jnp.allclose(out2, ref2, atol=1e-5, rtol=1e-5), "mismatch (tiled) vs reference"

    print("KERNEL_OK")
</pallas_src>

<mosaic_0001>
module attributes {stable_mosaic.version = 11 : i64} {
  func.func @_channel_attention_kernel(%arg0: i32, %arg1: i32, %arg2: memref<2x4x256xf32, #tpu.memory_space<vmem>>, %arg3: memref<4x2xf32, #tpu.memory_space<vmem>>, %arg4: memref<2x4xf32, #tpu.memory_space<vmem>>, %arg5: memref<2x4xf32, #tpu.memory_space<vmem>>, %arg6: memref<2x4xf32, #tpu.memory_space<vmem>>, %arg7: memref<2x4xf32, #tpu.memory_space<vmem>>) attributes {dimension_semantics = [#tpu.dimension_semantics<parallel>, #tpu.dimension_semantics<arbitrary>], iteration_bounds = array<i64: 1, 1>, scalar_prefetch = 0 : i64, scratch_operands = 2 : i64, tpu.core_type = #tpu.core_type<tc>, window_params = [{transform_indices = @transform_0, window_bounds = array<i64: 2, 4, 256>}, {pipeline_mode = #tpu.pipeline_mode<synchronous>, transform_indices = @transform_1, window_bounds = array<i64: 4, 2>}, {pipeline_mode = #tpu.pipeline_mode<synchronous>, transform_indices = @transform_2, window_bounds = array<i64: 2, 4>}, {transform_indices = @transform_3, window_bounds = array<i64: 2, 4>}]} {
    %c0_i32 = arith.constant 0 : i32
    %0 = arith.cmpi eq, %arg1, %c0_i32 : i32
    %1 = arith.extui %0 : i1 to i32
    %c0_i32_0 = arith.constant 0 : i32
    %2 = arith.cmpi ne, %1, %c0_i32_0 : i32
    scf.if %2 {
      %cst_14 = arith.constant 0.000000e+00 : f32
      %15 = vector.broadcast %cst_14 : f32 to vector<2x4xf32>
      %c0_15 = arith.constant 0 : index
      %c0_16 = arith.constant 0 : index
      %16 = vector.load %arg6[%c0_15, %c0_16] : memref<2x4xf32, #tpu.memory_space<vmem>>, vector<2x4xf32>
      tpu.vector_store %arg6[%c0_15, %c0_16], %15 {strides = array<i32>} : memref<2x4xf32, #tpu.memory_space<vmem>>, vector<2x4xf32>,
      %cst_17 = arith.constant 0xFF800000 : f32
      %17 = vector.broadcast %cst_17 : f32 to vector<2x4xf32>
      %c0_18 = arith.constant 0 : index
      %c0_19 = arith.constant 0 : index
      %18 = vector.load %arg7[%c0_18, %c0_19] : memref<2x4xf32, #tpu.memory_space<vmem>>, vector<2x4xf32>
      tpu.vector_store %arg7[%c0_18, %c0_19], %17 {strides = array<i32>} : memref<2x4xf32, #tpu.memory_space<vmem>>, vector<2x4xf32>,
    } else {
    }
    %c0 = arith.constant 0 : index
    %c0_1 = arith.constant 0 : index
    %c0_2 = arith.constant 0 : index
    %3 = vector.load %arg2[%c0, %c0_1, %c0_2] : memref<2x4x256xf32, #tpu.memory_space<vmem>>, vector<2x4x256xf32>
    %c0_3 = arith.constant 0 : index
    %c0_4 = arith.constant 0 : index
    %4 = vector.load %arg6[%c0_3, %c0_4] : memref<2x4xf32, #tpu.memory_space<vmem>>, vector<2x4xf32>
    %cst = arith.constant dense<0.000000e+00> : vector<2x4xf32>
    %5 = vector.multi_reduction <add>, %3, %cst [2] : vector<2x4x256xf32> to vector<2x4xf32>
    %6 = arith.addf %4, %5 : vector<2x4xf32>
    %c0_5 = arith.constant 0 : index
    %c0_6 = arith.constant 0 : index
    %7 = vector.load %arg6[%c0_5, %c0_6] : memref<2x4xf32, #tpu.memory_space<vmem>>, vector<2x4xf32>
    tpu.vector_store %arg6[%c0_5, %c0_6], %6 {strides = array<i32>} : memref<2x4xf32, #tpu.memory_space<vmem>>, vector<2x4xf32>,
    %c0_7 = arith.constant 0 : index
    %c0_8 = arith.constant 0 : index
    %8 = vector.load %arg7[%c0_7, %c0_8] : memref<2x4xf32, #tpu.memory_space<vmem>>, vector<2x4xf32>
    %cst_9 = arith.constant dense<0xFF800000> : vector<2x4xf32>
    %9 = vector.multi_reduction <maximumf>, %3, %cst_9 [2] : vector<2x4x256xf32> to vector<2x4xf32>
    %10 = arith.maximumf %8, %9 : vector<2x4xf32>
    %c0_10 = arith.constant 0 : index
    %c0_11 = arith.constant 0 : index
    %11 = vector.load %arg7[%c0_10, %c0_11] : memref<2x4xf32, #tpu.memory_space<vmem>>, vector<2x4xf32>
    tpu.vector_store %arg7[%c0_10, %c0_11], %10 {strides = array<i32>} : memref<2x4xf32, #tpu.memory_space<vmem>>, vector<2x4xf32>,
    %c0_i32_12 = arith.constant 0 : i32
    %12 = arith.cmpi eq, %arg1, %c0_i32_12 : i32
    %13 = arith.extui %12 : i1 to i32
    %c0_i32_13 = arith.constant 0 : i32
    %14 = arith.cmpi ne, %13, %c0_i32_13 : i32
    scf.if %14 {
      %c0_14 = arith.constant 0 : index
      %c0_15 = arith.constant 0 : index
      %15 = vector.load %arg6[%c0_14, %c0_15] : memref<2x4xf32, #tpu.memory_space<vmem>>, vector<2x4xf32>
      %cst_16 = arith.constant 3.906250e-03 : f32
      %16 = vector.broadcast %cst_16 : f32 to vector<2x4xf32>
      %17 = arith.mulf %15, %16 : vector<2x4xf32>
      %c0_17 = arith.constant 0 : index
      %c0_18 = arith.constant 0 : index
      %18 = vector.load %arg7[%c0_17, %c0_18] : memref<2x4xf32, #tpu.memory_space<vmem>>, vector<2x4xf32>
      %19 = tpu.concatenate %17, %18 in 0 : vector<2x4xf32>, vector<2x4xf32> -> vector<4x4xf32>
      %c0_19 = arith.constant 0 : index
      %c0_20 = arith.constant 0 : index
      %20 = vector.load %arg3[%c0_19, %c0_20] : memref<4x2xf32, #tpu.memory_space<vmem>>, vector<4x2xf32>
      %c0_21 = arith.constant 0 : index
      %c0_22 = arith.constant 0 : index
      %21 = vector.load %arg4[%c0_21, %c0_22] : memref<2x4xf32, #tpu.memory_space<vmem>>, vector<2x4xf32>
      %cst_23 = arith.constant dense<0.000000e+00> : vector<4x2xf32>
      %22 = tpu.matmul %19, %20, %cst_23 {dimension_numbers = #tpu.dot_dimension_numbers<[1], [0], [0], [1], [0, 0, 1, 1], [], []>} : vector<4x4xf32>, vector<4x2xf32>, vector<4x2xf32> -> vector<4x2xf32>
      %cst_24 = arith.constant 0.000000e+00 : f32
      %23 = vector.broadcast %cst_24 : f32 to vector<4x2xf32>
      %24 = arith.maximumf %22, %23 : vector<4x2xf32>
      %cst_25 = arith.constant dense<0.000000e+00> : vector<4x4xf32>
      %25 = tpu.matmul %24, %21, %cst_25 {dimension_numbers = #tpu.dot_dimension_numbers<[1], [0], [0], [1], [0, 0, 1, 1], [], []>} : vector<4x2xf32>, vector<2x4xf32>, vector<4x4xf32> -> vector<4x4xf32>
      %26 = vector.extract_strided_slice %25 {offsets = [0, 0], sizes = [2, 4], strides = [1, 1]} : vector<4x4xf32> to vector<2x4xf32>
      %27 = vector.extract_strided_slice %25 {offsets = [2, 0], sizes = [2, 4], strides = [1, 1]} : vector<4x4xf32> to vector<2x4xf32>
      %28 = arith.addf %26, %27 : vector<2x4xf32>
      %29 = arith.negf %28 : vector<2x4xf32>
      %30 = math.exp %29 : vector<2x4xf32>
      %cst_26 = arith.constant 1.000000e+00 : f32
      %31 = vector.broadcast %cst_26 : f32 to vector<2x4xf32>
      %32 = arith.addf %31, %30 : vector<2x4xf32>
      %33 = arith.divf %31, %32 : vector<2x4xf32>
      %c0_27 = arith.constant 0 : index
      %c0_28 = arith.constant 0 : index
      %34 = vector.load %arg5[%c0_27, %c0_28] : memref<2x4xf32, #tpu.memory_space<vmem>>, vector<2x4xf32>
      tpu.vector_store %arg5[%c0_27, %c0_28], %33 {strides = array<i32>} : memref<2x4xf32, #tpu.memory_space<vmem>>, vector<2x4xf32>,
    } else {
    }
    return
  }
  func.func @transform_0(%arg0: i32, %arg1: i32) -> (i32, i32, i32) {
    %c0_i32 = arith.constant 0 : i32
    %c0_i32_0 = arith.constant 0 : i32
    return %arg0, %c0_i32, %arg1 : i32, i32, i32
  }
  func.func @transform_1(%arg0: i32, %arg1: i32) -> (i32, i32) {
    %c0_i32 = arith.constant 0 : i32
    %c0_i32_0 = arith.constant 0 : i32
    %c0_i32_1 = arith.constant 0 : i32
    return %c0_i32, %c0_i32_0 : i32, i32
  }
  func.func @transform_2(%arg0: i32, %arg1: i32) -> (i32, i32) {
    %c0_i32 = arith.constant 0 : i32
    %c0_i32_0 = arith.constant 0 : i32
    %c0_i32_1 = arith.constant 0 : i32
    return %c0_i32, %c0_i32_0 : i32, i32
  }
  func.func @transform_3(%arg0: i32, %arg1: i32) -> (i32, i32) {
    %c0_i32 = arith.constant 0 : i32
    %c0_i32_0 = arith.constant 0 : i32
    return %arg0, %c0_i32 : i32, i32
  }
}

</mosaic_0001>

<bundles_post_ra>
// kernel: tpu_custom_call.1
= control target key start
LH: loop header
LB: loop body
LE: loop exit
PB: predicated region body
PF: predicated region fallthrough
CT: control target
= control target key end

     0   :  { %8 = vsyncpa [#allocation5], 0  ;;  %s444_s0 = inlined_call_operand.hbm [shape: f32[2,4,256], index: 0, kind: input, shape index: {}]   ;;  %s445_s1 = inlined_call_operand.vmem [shape: f32[4,2], index: 1, kind: input, shape index: {}]   ;;  %s446_s2 = inlined_call_operand.vmem [shape: f32[2,4], index: 2, kind: input, shape index: {}]   ;;  %s447_s3 = inlined_call_operand.hbm [shape: f32[2,4], index: 3, kind: output, shape index: {}]  }
   0x1   :  { %9 = vsyncpa [#allocation6], 0  ;;  %s373_s12 = smov [#allocation4]   ;;  %s325_s16 = scalar_lea.hbm %s444_s0, 256 }
   0x2   :  { %s15_s13 = sshll.u32 %s373_s12, 4  ;;  %p326_p0 = scmp.ne.s32.totalorder %s444_s0, %s325_s16  ;;  %s16_s13 = int_to_ptr.vmem [resolvable:$true] %s15_s13 }
   0x3   :  { %p329_p1 = scmp.lt.u32.totalorder %s325_s16, %s444_s0 }
   0x5   :  { %p331_p2 = pnand %p329_p1, %p326_p0 }
   0x7   :  { %334 = shalt.err (!%p331_p2)
}
   0x8   :  { %s335_s21 = scalar_lea.vmem %s16_s13, 256  ;;  %p340_p4 = scmp.lt.s32.totalorder %s16_s13, %s16_s13 }
   0x9   :  { %p336_p3 = scmp.ne.s32.totalorder %s16_s13, %s335_s21  ;;  %p341_p5 = scmp.lt.s32.totalorder %s335_s21, %s335_s21 }
   0xb   :  { %p342_p6 = por %p341_p5, %p340_p4 }
   0xd   :  { %p343_p7 = pnand %p342_p6, %p336_p3 }
   0xf   :  { %346 = shalt.err (!%p343_p7)
}
  0x10   :  { %s374_s22 = smov 128   ;;  %s375_s23 = smov 8  }
  0x11   :  { %21 = dma.hbm_to_vmem [thread:$0]  %s444_s0, 256, %s16_s13, [#allocation5], %s374_s22, %s374_s22, %s375_s23  }
  0x12   :  { %369 = dma.done.wait [#allocation5], 256  }
  0x13   :  { %370 = vsyncadd [#allocation5], 4294967040  ;;  %vm45_vm0 = vcmask 1043456   ;;  %v36_v0 = vld [vmem:[#allocation4] sm:$0xff]  ;;  %v37_v1 = vld [vmem:[#allocation4 + $0x8] sm:$0xff]  ;;  %vm33_vm1 = vcmask 25600   ;;  %v58_v19 = vlaneseq }
  0x14   :  { %v41_v2 = vcombine.high %v36_v0, %v36_v0  ;;  %v75_v3 = vsel %vm45_vm0, %v36_v0, -inf  ;;  %v46_v4 = vsel %vm45_vm0, %v36_v0, 0.0  ;;  %v42_v5 = vcombine.high %v37_v1, %v37_v1  ;;  %v110_v18 = vld [vmem:[%s445_s1] sm:$0xf]  ;;  %s379_s28 = smov [#allocation7]  }
  0x15   :  { %v80_v6 = vsel %vm45_vm0, %v37_v1, -inf  ;;  %v51_v7 = vsel %vm45_vm0, %v37_v1, 0.0  ;;  %v376_v16 = vmov -inf   ;;  %v377_v17 = vmov 0.0   ;;  %v111_v42 = vld [vmem:[%s446_s2] sm:$0x3] }
  0x16   :  { %v76_v8 = vsel %vm45_vm0, %v41_v2, -inf  ;;  %v47_v9 = vsel %vm45_vm0, %v41_v2, 0.0  ;;  %v81_v10 = vsel %vm45_vm0, %v42_v5, -inf  ;;  %v52_v11 = vsel %vm45_vm0, %v42_v5, 0.0  ;;  %35 = vst.msk [vmem:[#allocation3] sm:$0x3] %vm33_vm1, %v376_v16  ;;  %302 = vmatprep.subr.mxu0 %v377_v17  ;;  %307 = vmatprep.subr.mxu1 %v377_v17 }
  0x17   :  { %v77_v12 = vmax.f32 %v75_v3, %v76_v8  ;;  %v48_v13 = vadd.f32 %v47_v9, %v46_v4  ;;  %v82_v14 = vmax.f32 %v80_v6, %v81_v10  ;;  %v53_v15 = vadd.f32 %v52_v11, %v51_v7  ;;  %34 = vst.msk [vmem:[#allocation2] sm:$0x3] %vm33_vm1, %v377_v17  ;;  %s284_s29 = sshll.u32 %s379_s28, 4  ;;  %s285_s29 = int_to_ptr.vmem [resolvable:$true] %s284_s29 }
  0x18   :  { %303 = vmatpush3.msk.msra.mxu0 %vm45_vm0, %v110_v18  ;;  %vm378_vm2 = vmmov 0   ;;  %v59_v20 = vand.u32 127, %v58_v19  ;;  %v61_v21 = vshrl.u32 %v58_v19, 7  ;;  %vm68_vm3 = vcmask 1041409   ;;  %s347_s2 = scalar_lea.vmem %s285_s29, 32  ;;  %p352_p9 = scmp.lt.s32.totalorder %s285_s29, %s285_s29 }
  0x19   :  { %78 = vmax.xlane.f32.xlu1 %v77_v12  ;;  %49 = vadd.xlane.f32.xlu0 %v48_v13  ;;  %vm108_vm4 = vcmask 1041408   ;;  %vm112_vm5 = vcmask 31744   ;;  %vm190_vm6 = vcmask 15360   ;;  %p348_p8 = scmp.ne.s32.totalorder %s285_s29, %s347_s2  ;;  %p353_p10 = scmp.lt.s32.totalorder %s347_s2, %s347_s2 }
  0x1a   :  { %304 = vmatprep.mubr.msk.f32.mxu0 %vm378_vm2, %v377_v17  ;;  %309 = vmatprep.mubr.msk.f32.mxu1 %vm378_vm2, %v377_v17  ;;  %v62_v24 = vsub.s32 %v59_v20, %v61_v21 }
  0x1b   :  { %308 = vmatpush3.msk.msra.mxu1 %vm108_vm4, %v111_v42  ;;  %p354_p11 = por %p353_p10, %p352_p9 }
  0x1d   :  { %83 = vmax.xlane.f32.xlu1 %v82_v14  ;;  %54 = vadd.xlane.f32.xlu0 %v53_v15  ;;  %v74_v29 = vld [vmem:[#allocation3] sm:$0x3]  ;;  %p355_p12 = pnand %p354_p11, %p348_p8 }
  0x1e   :  { %v38_v32 = vld [vmem:[#allocation2] sm:$0x3] }
  0xa6   :  { %v79_v22 = vpop.xlane.xlu1 %78  ;;  %v50_v23 = vpop.xlane.xlu0 %49 }
  0xa7   :  { %v90_v27 = vrot.slane %v79_v22, %v62_v24  ;;  %v63_v28 = vrot.slane %v50_v23, %v62_v24 }
  0xaa   :  { %v84_v25 = vpop.xlane.xlu1 %83  ;;  %v55_v26 = vpop.xlane.xlu0 %54 }
  0xab   :  { %v94_v30 = vrot.slane %v84_v25, %v62_v24  ;;  %v67_v31 = vrot.slane %v55_v26, %v62_v24 }
  0xad   :  { %v95_v33 = vsel %vm68_vm3, %v94_v30, %v90_v27  ;;  %v69_v34 = vsel %vm68_vm3, %v67_v31, %v63_v28 }
  0xae   :  { %v97_v35 = vmax.f32 %v74_v29, %v95_v33  ;;  %v71_v36 = vadd.f32 %v69_v34, %v38_v32 }
  0xb0   :  { %98 = vst.msk [vmem:[#allocation3] sm:$0x3] %vm33_vm1, %v97_v35  ;;  %73 = vst.msk [vmem:[#allocation2] sm:$0x3] %vm33_vm1, %v71_v36 }
  0xb7   :  { %v102_v37 = vld [vmem:[#allocation2] sm:$0x3]  ;;  %v104_v38 = vld [vmem:[#allocation3] sm:$0x3] }
  0xb8   :  { %v103_v39 = vmul.f32 0.00390625, %v102_v37  ;;  %v106_v40 = vrot.slane %v104_v38, 6 }
  0xba   :  { %v109_v41 = vsel %vm108_vm4, %v103_v39, %v106_v40 }
  0xbb   :  { %305 = vmatmul.mubr.msk.f32.vlgmr.msra.gmra.mrb[0].mxu0 %vm112_vm5, %v109_v41 }
 0x18e   :  { %v185_v43 = vpop.f32.mrb[0].mxu0 }
 0x18f   :  { %v189_v44 = vmax.f32 %v185_v43, 0.0  ;;  %v306_v45 = vpop.f32.mrb[1].mxu0 }
 0x191   :  { %310 = vmatmul.mubr.msk.f32.vlgmr.msra.gmra.mrb[0].mxu1 %vm190_vm6, %v189_v44 }
 0x264   :  { %v263_v46 = vpop.f32.mrb[0].mxu1 }
 0x265   :  { %v268_v47 = vrot.slane %v263_v46, 2  ;;  %v311_v48 = vpop.f32.mrb[1].mxu1 }
 0x267   :  { %v270_v49 = vadd.f32 %v268_v47, %v263_v46 }
 0x269   :  { %v297_v50 = vmul.f32 -1.442695, %v270_v49 }
 0x26b   :  { %321 = vpow2.f32 %v297_v50 }
 0x275   :  { %v322_v51 = vpop.eup %321 }
 0x276   :  { %v274_v52 = vadd.f32 1.0, %v322_v51 }
 0x278   :  { %323 = vrcp.f32 %v274_v52 }
 0x282   :  { %v324_v53 = vpop.eup %323 }
 0x283   :  { %277 = vst.msk [vmem:[#allocation7] sm:$0x3] %vm33_vm1, %v324_v53 }
 0x284   :  { %358 = shalt.err (!%p355_p12)
}
 0x285   :  { %s359_s5 = scalar_lea.hbm %s447_s3, 32 }
 0x286   :  { %p360_p13 = scmp.ne.s32.totalorder %s447_s3, %s359_s5  ;;  %p363_p0 = scmp.lt.u32.totalorder %s359_s5, %s447_s3 }
 0x288   :  { %p365_p1 = pnand %p363_p0, %p360_p13 }
 0x28a   :  { %368 = shalt.err (!%p365_p1)
}
 0x28b   :  { %287 = dma.vmem_to_hbm [thread:$0]  %s285_s29, 32, %s447_s3, [#allocation6]  }
 0x28c   :  { %371 = dma.done.wait [#allocation6], 32  }
 0x28d   :  { %372 = vsyncadd [#allocation6], 4294967264 }
 0x28e   :  { %291 = vsyncpa [#allocation5], 1 }
 0x28f   :  { %292 = vsyncpa [#allocation6], 1 }

</bundles_post_ra>
